<compile_context>
chip_gen: v6e
topology: v6e:2x2x1
jax: 0.10.0
libtpu: 0.0.40
codegen_flags: <defaults>
</compile_context>

<pallas_src>
import jax
import jax.numpy as jnp
from jax import lax
from jax.experimental import pallas as pl
from jax.experimental.pallas import tpu as pltpu


def _round_up(n, m):
    return ((n + m - 1) // m) * m


def collapse_params(params):
    """Fold the 3 affine layers (no nonlinearity between them) into y = x @ wc + bc."""
    (w1, b1), (w2, b2), (w3, b3) = params
    hi = lax.Precision.HIGHEST  # tiny matrices; keep the fold fp32-exact
    wc = jnp.dot(jnp.dot(w1, w2, precision=hi), w3, precision=hi)            # (27, 2)
    bc = jnp.dot(jnp.dot(b1, w2, precision=hi) + b2, w3, precision=hi) + b3  # (1, 2)
    return wc, bc


def mlp_kernel(x_ref, wct_ref, bct_ref, ot_ref):
    # x_ref:   (tile, c_in)  batch-major tile streamed straight from HBM (no external x.T)
    # wct_ref: (c_out, c_in) collapsed weight, VMEM-resident
    # bct_ref: (c_out, 1)    collapsed bias,   VMEM-resident
    # ot_ref:  (c_out, tile) batch on lanes -> lane-dense unmasked stores.
    yt = lax.dot_general(
        wct_ref[...], x_ref[...],
        dimension_numbers=(((1,), (1,)), ((), ())),   # contract over the feature axis
        preferred_element_type=jnp.float32,
        precision=lax.Precision.HIGHEST,              # free here; kernel is HBM-bound
    )
    ot_ref[...] = (yt + bct_ref[...]).astype(ot_ref.dtype)


def mlp_forward(x, params, *, tile_b=8192):
    """x: (B, input_channel) f32.  params: [(W (in,out), b (1,out)), ...] x3.  Returns (B, num_classes)."""
    wc, bc = collapse_params(params)
    wct = wc.T                    # (c_out, c_in) = (2, 27)
    bct = bc.T                    # (c_out, 1)

    B, c_in = x.shape
    c_out = wct.shape[0]

    # Batch tiling: small batches use one full-extent block (no 8/128 divisibility needed);
    # larger batches use 128-aligned tiles with a ragged (masked-writeback) final block.
    if B <= tile_b:
        tile = B
    else:
        tile = min(_round_up(tile_b, 128), _round_up(B, 128))
    grid = (pl.cdiv(B, tile),)

    itemsize = jnp.dtype(x.dtype).itemsize
    cost = pl.CostEstimate(
        flops=2 * B * c_in * c_out,
        transcendentals=0,
        bytes_accessed=(B * (c_in + c_out)) * itemsize + (wct.size + bct.size) * 4,
    )

    yt = pl.pallas_call(
        mlp_kernel,
        out_shape=jax.ShapeDtypeStruct((c_out, B), x.dtype),
        grid=grid,
        in_specs=[
            pl.BlockSpec((tile, c_in), lambda i: (i, 0)),    # streamed x tile (natural layout)
            pl.BlockSpec((c_out, c_in), lambda i: (0, 0)),   # collapsed weight (VMEM-resident)
            pl.BlockSpec((c_out, 1), lambda i: (0, 0)),      # collapsed bias   (VMEM-resident)
        ],
        out_specs=pl.BlockSpec((c_out, tile), lambda i: (0, i)),
        compiler_params=pltpu.CompilerParams(
            dimension_semantics=("parallel",),  # independent batch tiles (uses both v7x TCs)
        ),
        cost_estimate=cost,
    )(x, wct, bct)

    # Module interface requires (B, num_classes); this copy is ~8 B/row vs the 108 B/row
    # input read.  TODO(synk): skip if a (num_classes, B) consumer layout is acceptable.
    return yt.T


def init_params(key, input_channel=27, dims=(21, 30), num_classes=2):
    """Deterministic PyTorch-style init: U(-1/sqrt(fan_in), 1/sqrt(fan_in))."""
    layer_shapes = [(input_channel, dims[0])]
    layer_shapes += [(dims[i], dims[i + 1]) for i in range(len(dims) - 1)]
    layer_shapes += [(dims[-1], num_classes)]
    params = []
    for fan_in, fan_out in layer_shapes:
        key, kw, kb = jax.random.split(key, 3)
        bound = 1.0 / (fan_in ** 0.5)
        w = jax.random.uniform(kw, (fan_in, fan_out), jnp.float32, -bound, bound)
        b = jax.random.uniform(kb, (1, fan_out), jnp.float32, -bound, bound)
        params.append((w, b))
    return params, key


def _check(x, params, *, tile_b):
    y = mlp_forward(x, params, tile_b=tile_b)
    jax.block_until_ready(y)

    B = x.shape[0]
    num_classes = params[-1][0].shape[1]
    assert y.shape == (B, num_classes)

    hi = lax.Precision.HIGHEST

    # (a) Strict check against a pure-JAX version of the exact computation the kernel
    #     performs (same collapsed operands, same association, full precision).
    wc, bc = collapse_params(params)
    ref_c = jnp.dot(x, wc, precision=hi) + bc
    assert jnp.allclose(y, ref_c, atol=1e-4, rtol=1e-4), "mismatch vs collapsed reference"

    # (b) Semantic check against the original layer-by-layer module (reassociation only,
    #     since the kernel runs at HIGHEST precision).
    ref = x
    for (w, b) in params:
        ref = jnp.dot(ref, w, precision=hi) + b
    assert jnp.allclose(y, ref, atol=1e-3, rtol=1e-3), "mismatch vs layer-by-layer reference"


if __name__ == "__main__":
    key = jax.random.PRNGKey(0)
    input_channel, dims, num_classes = 27, [21, 30], 2

    params, key = init_params(key, input_channel, tuple(dims), num_classes)

    # Small batch: single full-extent block path (default tile_b).
    key, kx = jax.random.split(key)
    x_small = jax.random.normal(kx, (8, input_channel), jnp.float32)
    _check(x_small, params, tile_b=8192)

    # Multi-tile with ragged final block (B not a multiple of the tile; masked writeback).
    key, kx = jax.random.split(key)
    x_ragged = jax.random.normal(kx, (300, input_channel), jnp.float32)
    _check(x_ragged, params, tile_b=128)

    # Multi-tile, exact multiple of the tile.
    key, kx = jax.random.split(key)
    x_mult = jax.random.normal(kx, (256, input_channel), jnp.float32)
    _check(x_mult, params, tile_b=128)

    print("KERNEL_OK")
</pallas_src>

<mosaic_0001>
module attributes {stable_mosaic.version = 11 : i64} {
  func.func @mlp_kernel(%arg0: i32, %arg1: memref<8x27xf32, #tpu.memory_space<vmem>>, %arg2: memref<2x27xf32, #tpu.memory_space<vmem>>, %arg3: memref<2x1xf32, #tpu.memory_space<vmem>>, %arg4: memref<2x8xf32, #tpu.memory_space<vmem>>) attributes {dimension_semantics = [#tpu.dimension_semantics<parallel>], iteration_bounds = array<i64: 1>, scalar_prefetch = 0 : i64, scratch_operands = 0 : i64, tpu.core_type = #tpu.core_type<tc>, window_params = [{transform_indices = @transform_0, window_bounds = array<i64: 8, 27>}, {pipeline_mode = #tpu.pipeline_mode<synchronous>, transform_indices = @transform_1, window_bounds = array<i64: 2, 27>}, {pipeline_mode = #tpu.pipeline_mode<synchronous>, transform_indices = @transform_2, window_bounds = array<i64: 2, 1>}, {transform_indices = @transform_3, window_bounds = array<i64: 2, 8>}]} {
    %c0 = arith.constant 0 : index
    %c0_0 = arith.constant 0 : index
    %0 = vector.load %arg2[%c0, %c0_0] : memref<2x27xf32, #tpu.memory_space<vmem>>, vector<2x27xf32>
    %c0_1 = arith.constant 0 : index
    %c0_2 = arith.constant 0 : index
    %1 = vector.load %arg1[%c0_1, %c0_2] : memref<8x27xf32, #tpu.memory_space<vmem>>, vector<8x27xf32>
    %cst = arith.constant dense<0.000000e+00> : vector<2x8xf32>
    %2 = tpu.matmul %0, %1, %cst {dimension_numbers = #tpu.dot_dimension_numbers<[1], [1], [0], [0], [0, 0, 1, 0], [], []>, precision = #tpu.contract_precision<fp32>} : vector<2x27xf32>, vector<8x27xf32>, vector<2x8xf32> -> vector<2x8xf32>
    %c0_3 = arith.constant 0 : index
    %c0_4 = arith.constant 0 : index
    %3 = vector.load %arg3[%c0_3, %c0_4] : memref<2x1xf32, #tpu.memory_space<vmem>>, vector<2x1xf32>
    %4 = vector.broadcast %3 : vector<2x1xf32> to vector<2x8xf32>
    %5 = arith.addf %2, %4 : vector<2x8xf32>
    %c0_5 = arith.constant 0 : index
    %c0_6 = arith.constant 0 : index
    %6 = vector.load %arg4[%c0_5, %c0_6] : memref<2x8xf32, #tpu.memory_space<vmem>>, vector<2x8xf32>
    tpu.vector_store %arg4[%c0_5, %c0_6], %5 {strides = array<i32>} : memref<2x8xf32, #tpu.memory_space<vmem>>, vector<2x8xf32>,
    return
  }
  func.func @transform_0(%arg0: i32) -> (i32, i32) {
    %c0_i32 = arith.constant 0 : i32
    %c0_i32_0 = arith.constant 0 : i32
    return %arg0, %c0_i32 : i32, i32
  }
  func.func @transform_1(%arg0: i32) -> (i32, i32) {
    %c0_i32 = arith.constant 0 : i32
    %c0_i32_0 = arith.constant 0 : i32
    %c0_i32_1 = arith.constant 0 : i32
    return %c0_i32, %c0_i32_0 : i32, i32
  }
  func.func @transform_2(%arg0: i32) -> (i32, i32) {
    %c0_i32 = arith.constant 0 : i32
    %c0_i32_0 = arith.constant 0 : i32
    %c0_i32_1 = arith.constant 0 : i32
    return %c0_i32, %c0_i32_0 : i32, i32
  }
  func.func @transform_3(%arg0: i32) -> (i32, i32) {
    %c0_i32 = arith.constant 0 : i32
    %c0_i32_0 = arith.constant 0 : i32
    return %c0_i32, %arg0 : i32, i32
  }
}

</mosaic_0001>

<bundles_post_ra>
// kernel: tpu_custom_call.1
= control target key start
LH: loop header
LB: loop body
LE: loop exit
PB: predicated region body
PF: predicated region fallthrough
CT: control target
= control target key end

     0   :  { %8 = vsyncpa [#allocation3], 0  ;;  %s640_s0 = inlined_call_operand.hbm [shape: f32[8,27], index: 0, kind: input, shape index: {}]   ;;  %s641_s1 = inlined_call_operand.vmem [shape: f32[2,27], index: 1, kind: input, shape index: {}]   ;;  %s642_s2 = inlined_call_operand.vmem [shape: f32[2,1], index: 2, kind: input, shape index: {}]   ;;  %s643_s3 = inlined_call_operand.hbm [shape: f32[2,8], index: 3, kind: output, shape index: {}]  }
   0x1   :  { %9 = vsyncpa [#allocation4], 0  ;;  %s597_s12 = smov [#allocation2]  }
   0x2   :  { %s16_s13 = sshll.u32 %s597_s12, 4  ;;  %s17_s13 = int_to_ptr.vmem [resolvable:$true] %s16_s13 }
   0x3   :  { %s561_s14 = scalar_lea.vmem %s17_s13, 128  ;;  %p566_p1 = scmp.lt.s32.totalorder %s17_s13, %s17_s13 }
   0x4   :  { %p562_p0 = scmp.ne.s32.totalorder %s17_s13, %s561_s14  ;;  %p567_p2 = scmp.lt.s32.totalorder %s561_s14, %s561_s14 }
   0x6   :  { %p568_p3 = por %p567_p2, %p566_p1 }
   0x8   :  { %p569_p4 = pnand %p568_p3, %p562_p0 }
   0xa   :  { %572 = shalt.err (!%p569_p4)
}
   0xb   :  { %19 = dma.hbm_to_vmem [thread:$0]  %s640_s0, 128, %s17_s13, [#allocation3]  }
   0xc   :  { %593 = dma.done.wait [#allocation3], 128  }
   0xd   :  { %594 = vsyncadd [#allocation3], 4294967168  ;;  %v598_v0 = vmov 0.0   ;;  %vm599_vm0 = vmmov 0   ;;  %v600_v1 = vmov 0   ;;  %vm35_vm1 = vcmask 220160  }
   0xe   :  { %517 = vmatprep.subr.mxu0 %v598_v0  ;;  %519 = vmatprep.mubr.msk.f32.mxu0 %vm599_vm0, %v598_v0  ;;  %v28_v2 = vld [vmem:[#allocation2] sm:$0xff]  ;;  %vm488_vm2 = vcmask 58368  }
   0xf   :  { %522 = vmatprep.subr.mxu1 %v598_v0  ;;  %524 = vmatprep.mubr.msk.f32.mxu1 %vm599_vm0, %v598_v0  ;;  %v27_v3 = vld [vmem:[%s641_s1] sm:$0x3]  ;;  %v40_v5 = vsel %vm35_vm1, %v28_v2, 0  ;;  %s601_s1 = smov [#allocation5]  }
  0x10   :  { %552 = vset.pattern.permute.xlu0 %v600_v1  ;;  %v29_v4 = vld [vmem:[%s642_s2] sm:$0x3]  ;;  %v37_v6 = vsel %vm35_vm1, %v27_v3, 0  ;;  %v73_v7 = vand.u32 4294901760, %v40_v5  ;;  %s496_s2 = sshll.u32 %s601_s1, 4  ;;  %s497_s2 = int_to_ptr.vmem [resolvable:$true] %s496_s2 }
  0x11   :  { %32 = vperm.xlu0 %552, %v29_v4   ;;  %v108_v8 = vand.u32 4294901760, %v37_v6  ;;  %s573_s20 = scalar_lea.vmem %s497_s2, 32  ;;  %p578_p6 = scmp.lt.s32.totalorder %s497_s2, %s497_s2 }
  0x12   :  { %518 = vmatpush3.xpose.msra.mxu0 %v73_v7  ;;  %v150_v10 = vsub.f32 %v40_v5, %v73_v7  ;;  %p574_p5 = scmp.ne.s32.totalorder %s497_s2, %s573_s20  ;;  %p579_p7 = scmp.lt.s32.totalorder %s573_s20, %s573_s20 }
  0x13   :  { %v109_v9 = vsub.f32 %v37_v6, %v108_v8  ;;  %527 = vmatprep.subr.mxu0 %v598_v0 }
  0x14   :  { %v151_v12 = vand.u32 4294901760, %v150_v10  ;;  %p580_p8 = por %p579_p7, %p578_p6 }
  0x15   :  { %v110_v11 = vand.u32 4294901760, %v109_v9 }
  0x16   :  { %v152_v14 = vsub.f32 %v150_v10, %v151_v12  ;;  %p581_p9 = pnand %p580_p8, %p574_p5 }
  0x17   :  { %v111_v13 = vsub.f32 %v109_v9, %v110_v11 }
  0x18   :  { %v153_v16 = vand.u32 4294901760, %v152_v14 }
  0x19   :  { %v112_v15 = vand.u32 4294901760, %v111_v13 }
  0x1a   :  { %523 = vmatpush3.xpose.msra.mxu1 %v153_v16 }
  0x1b   :  { %520 = vmatmul.mubr.f32.vlgmr.msra.gmra.mxu0 %v112_v15  ;;  %532 = vmatprep.subr.mxu1 %v598_v0 }
  0x1c   :  { %528 = vmatpush3.xpose.msra.mxu0 %v150_v10  ;;  %529 = vmatprep.mubr.msk.f32.mxu0 %vm599_vm0, %v598_v0 }
  0x1d   :  { %537 = vmatprep.subr.mxu0 %v598_v0  ;;  %525 = vmatmul.mubr.f32.vlgmr.msra.gmra.mxu1 %v108_v8 }
  0x1e   :  { %533 = vmatpush3.xpose.msra.mxu1 %v73_v7  ;;  %534 = vmatprep.mubr.msk.f32.mxu1 %vm599_vm0, %v598_v0 }
  0x1f   :  { %530 = vmatmul.mubr.f32.vlgmr.msra.gmra.mxu0 %v109_v9  ;;  %542 = vmatprep.subr.mxu1 %v598_v0 }
  0x20   :  { %538 = vmatpush3.xpose.msra.mxu0 %v151_v12  ;;  %539 = vmatprep.mubr.msk.f32.mxu0 %vm599_vm0, %v598_v0 }
  0x21   :  { %535 = vmatmul.mubr.f32.vlgmr.msra.gmra.mxu1 %v110_v11 }
  0x22   :  { %543 = vmatpush3.xpose.msra.mxu1 %v73_v7  ;;  %544 = vmatprep.mubr.msk.f32.mxu1 %vm599_vm0, %v598_v0 }
  0x23   :  { %540 = vmatmul.mubr.f32.vlgmr.msra.gmra.mxu0 %v108_v8 }
  0x25   :  { %545 = vmatmul.mubr.f32.vlgmr.msra.gmra.mxu1 %v108_v8 }
  0x8c   :  { %v33_v17 = vpop.permute.xlu0 %32 }
  0xdb   :  { %v114_v18 = vpop.f32.mrf.mxu0 }
  0xdc   :  { %v115_v19 = vadd.f32 %v114_v18, %v33_v17 }
  0xdd   :  { %v521_v20 = vpop.f32.mrf.mxu0  ;;  %v190_v21 = vpop.f32.mrf.mxu1 }
  0xde   :  { %v191_v22 = vadd.f32 %v190_v21, %v115_v19 }
  0xdf   :  { %v264_v23 = vpop.f32.mrf.mxu0  ;;  %v526_v24 = vpop.f32.mrf.mxu1 }
  0xe0   :  { %v265_v25 = vadd.f32 %v264_v23, %v191_v22 }
  0xe1   :  { %v531_v26 = vpop.f32.mrf.mxu0  ;;  %v338_v27 = vpop.f32.mrf.mxu1 }
  0xe2   :  { %v339_v28 = vadd.f32 %v338_v27, %v265_v25 }
  0xe3   :  { %v412_v29 = vpop.f32.mrf.mxu0  ;;  %v536_v30 = vpop.f32.mrf.mxu1 }
  0xe4   :  { %v413_v31 = vadd.f32 %v412_v29, %v339_v28 }
  0xe5   :  { %v541_v32 = vpop.f32.mrf.mxu0  ;;  %v484_v33 = vpop.f32.mrf.mxu1 }
  0xe6   :  { %v485_v34 = vadd.f32 %v484_v33, %v413_v31 }
  0xe7   :  { %v546_v35 = vpop.f32.mrf.mxu1 }
  0xe8   :  { %489 = vst.msk [vmem:[#allocation5] sm:$0x3] %vm488_vm2, %v485_v34 }
  0xe9   :  { %584 = shalt.err (!%p581_p9)
}
  0xea   :  { %499 = dma.vmem_to_hbm [thread:$0]  %s497_s2, 32, %s643_s3, [#allocation4]  }
  0xeb   :  { %595 = dma.done.wait [#allocation4], 32  }
  0xec   :  { %596 = vsyncadd [#allocation4], 4294967264 }
  0xed   :  { %503 = vsyncpa [#allocation3], 1 }
  0xee   :  { %504 = vsyncpa [#allocation4], 1 }

</bundles_post_ra>
